<compile_context>
chip_gen: v7x
topology: tpu7x:2x2x1
jax: 0.10.0
libtpu: 0.0.40
codegen_flags: <defaults>
</compile_context>

<pallas_src>
import functools

import jax
import jax.numpy as jnp
from jax.experimental import pallas as pl
from jax.experimental.pallas import tpu as pltpu


def _round_up(n, m):
    return ((n + m - 1) // m) * m


def _cdiv(a, b):
    return -(-a // b)


def _gated_attn_kernel(x_ref, wab_ref, bab_ref, wc_ref, bc_ref, out_ref, *,
                       hidden_d, reduce_c, proj_dtype):
    """One row-tile of Attn_Net_Gated.

    x_ref   : (block, L)         input tile, native dtype (bf16 fast path)
    wab_ref : (L, 2*Dp)          [Wa^T | Wb^T], hidden dim padded to 128
    bab_ref : (1, 2*Dp)          [ba | bb], f32
    wc_ref  : (1, Dp) / (Dp, C)  attention_c weight (input dtype)
    bc_ref  : (1, C)             attention_c bias, f32
    out_ref : (1, 1, block) if reduce_c else (block, C)
    """
    # Fused a/b projection: ONE (block, L) @ (L, 2Dp) MXU matmul, f32 accum.
    h = jnp.dot(x_ref[...], wab_ref[...], preferred_element_type=jnp.float32)
    h = h + bab_ref[...]                                  # (block, 2Dp), f32
    a = jnp.tanh(h[:, :hidden_d])
    # sigmoid(z) = 0.5 * (tanh(z/2) + 1): single EUP push per element.
    b = 0.5 * (jnp.tanh(0.5 * h[:, hidden_d:]) + 1.0)
    gated = a * b                                         # (block, Dp), f32

    if reduce_c:
        # n_classes == 1: compute Wc @ gated^T so the per-row scalars come
        # out lane-major; the (1, 1, block) writeback is a dense unmasked vst
        # instead of a (block, 1) masked partial store.  MXU/XLU have slack.
        out = jnp.dot(wc_ref[...], gated.astype(proj_dtype).T,
                      preferred_element_type=jnp.float32)     # (1, block)
        out = out + bc_ref[...]                               # + bias (1, 1)
        out_ref[...] = out.reshape(out_ref.shape).astype(out_ref.dtype)
    else:
        # Keep operands in the input dtype (no f32 upcast); f32 accumulation.
        out = jnp.dot(gated.astype(proj_dtype), wc_ref[...],
                      preferred_element_type=jnp.float32)     # (block, C)
        out = out + bc_ref[...]
        out_ref[...] = out.astype(out_ref.dtype)


@functools.partial(jax.jit, static_argnames=("block_n", "out_dtype"))
def attn_net_gated_forward(x, wa, ba, wb, bb, wc, bc, *, block_n=1024,
                           out_dtype=None):
    """Pallas forward of Attn_Net_Gated. Returns (A, x).

    x:  (N, L)   -- pass bf16 x (and weights) for the HBM-bound fast path;
                    no wrapper cast is performed.  Accumulation is f32.
    wa: (D, L), ba: (D,)   attention_a Linear weights (PyTorch layout)
    wb: (D, L), bb: (D,)   attention_b Linear weights
    wc: (C, D), bc: (C,)   attention_c Linear weights
    out_dtype: dtype of A (default: x.dtype; pass jnp.float32 for f32 logits).
    """
    N, L = x.shape
    D = wa.shape[0]
    C = wc.shape[0]
    dt = x.dtype
    out_dt = dt if out_dtype is None else jnp.dtype(out_dtype)

    # ---- weight glue (tiny arrays, folded at trace time) -------------------
    # Pad hidden dim to a lane-tile multiple so the h[:, :Dp] / h[:, Dp:]
    # slices are clean (8,128)-tile views.  Padded columns carry zero weight
    # and zero bias -> tanh(0) * sigmoid(0) = 0 contribution; Wc is padded
    # with zeros along D as well.
    Dp = _round_up(D, 128)
    wa_t = jnp.pad(wa.T, ((0, 0), (0, Dp - D)))
    wb_t = jnp.pad(wb.T, ((0, 0), (0, Dp - D)))
    w_ab = jnp.concatenate([wa_t, wb_t], axis=1).astype(dt)        # (L, 2Dp)
    b_ab = jnp.concatenate([jnp.pad(ba, (0, Dp - D)),
                            jnp.pad(bb, (0, Dp - D))]).reshape(1, 2 * Dp)
    b_ab = b_ab.astype(jnp.float32)

    reduce_c = (C == 1)
    if reduce_c:
        wc_in = jnp.pad(wc, ((0, 0), (0, Dp - D))).astype(dt)      # (1, Dp)
    else:
        wc_in = jnp.pad(wc.T, ((0, Dp - D), (0, 0))).astype(dt)    # (Dp, C)
    bc_in = bc.reshape(1, C).astype(jnp.float32)

    # ---- row-tile selection (no padded copy of x; Pallas masks the ragged
    #      last block, rows >= N are never stored) ---------------------------
    itemsize = jnp.dtype(dt).itemsize
    block = max(8, _round_up(min(block_n, N), 8))
    # Keep each double-buffered x tile <= ~4 MiB: safe on v7x (64 MiB VMEM)
    # and under v5e's 16 MiB scoped default, with headroom for weights.
    max_rows = max(8, ((4 * 1024 * 1024) // max(1, L * itemsize)) // 8 * 8)
    block = min(block, max_rows)
    # v7x megacore: keep >= 2 grid steps so the "parallel" axis can shard
    # across both TensorCores (no-op on single-TC v5e/v6e).
    if N > 8:
        block = min(block, _round_up(_cdiv(N, 2), 8))
    grid_n = _cdiv(N, block)

    if reduce_c:
        # Lane-major output slab; wrapper reshapes back to (N, 1).
        out_shape = jax.ShapeDtypeStruct((grid_n, 1, block), out_dt)
        out_spec = pl.BlockSpec((1, 1, block), lambda i: (i, 0, 0))
    else:
        out_shape = jax.ShapeDtypeStruct((N, C), out_dt)
        out_spec = pl.BlockSpec((block, C), lambda i: (i, 0))

    kernel = functools.partial(_gated_attn_kernel, hidden_d=Dp,
                               reduce_c=reduce_c, proj_dtype=dt)

    out = pl.pallas_call(
        kernel,
        out_shape=out_shape,
        grid_spec=pltpu.PrefetchScalarGridSpec(
            num_scalar_prefetch=0,
            grid=(grid_n,),
            in_specs=[
                pl.BlockSpec((block, L), lambda i: (i, 0)),       # x tile
                pl.BlockSpec((L, 2 * Dp), lambda i: (0, 0)),      # [Wa^T|Wb^T]
                pl.BlockSpec((1, 2 * Dp), lambda i: (0, 0)),      # [ba|bb]
                pl.BlockSpec(wc_in.shape, lambda i: (0, 0)),      # Wc
                pl.BlockSpec((1, C), lambda i: (0, 0)),           # bc
            ],
            out_specs=out_spec,
        ),
        compiler_params=pltpu.CompilerParams(
            dimension_semantics=("parallel",),
            vmem_limit_bytes=32 * 1024 * 1024),
    )(x, w_ab, b_ab, wc_in, bc_in)

    if reduce_c:
        A = out.reshape(-1)[:N].reshape(N, 1)
    else:
        A = out
    # Module returns (A, x); x passes through untouched (no copy).
    return A, x


def _reference_forward(x, wa, ba, wb, bb, wc, bc):
    a = jnp.tanh(x @ wa.T + ba)
    b = jax.nn.sigmoid(x @ wb.T + bb)
    A = (a * b) @ wc.T + bc
    return A, x


if __name__ == "__main__":
    # Small shapes consistent with the module (L = input feat dim, D = hidden,
    # n_classes = 1).  N is deliberately NOT a multiple of the block size to
    # exercise the ragged-last-block (no-pad) path.
    L, D, N = 256, 128, 200

    key = jax.random.PRNGKey(0)
    kx, kwa, kba, kwb, kbb, kwc, kbc = jax.random.split(key, 7)

    x = jax.random.normal(kx, (N, L), dtype=jnp.float32)
    wa = jax.random.normal(kwa, (D, L), dtype=jnp.float32) * 0.1
    ba = jax.random.normal(kba, (D,), dtype=jnp.float32) * 0.1
    wb = jax.random.normal(kwb, (D, L), dtype=jnp.float32) * 0.1
    bb = jax.random.normal(kbb, (D,), dtype=jnp.float32) * 0.1

    ok = True
    # dropout=False in the default module config, so no dropout here.
    for C in (1, 3):   # exercise both the lane-major reduce path and C>1 path
        kc1, kc2 = jax.random.split(jax.random.fold_in(kwc, C))
        wc = jax.random.normal(kc1, (C, D), dtype=jnp.float32) * 0.1
        bc = jax.random.normal(kc2, (C,), dtype=jnp.float32) * 0.1

        A, x_out = attn_net_gated_forward(x, wa, ba, wb, bb, wc, bc)
        A = jax.block_until_ready(A)
        x_out = jax.block_until_ready(x_out)

        A_ref, _ = _reference_forward(x, wa, ba, wb, bb, wc, bc)
        ok &= A.shape == (N, C)
        ok &= x_out.shape == (N, L)
        ok &= bool(jnp.allclose(A, A_ref, atol=2e-4, rtol=2e-4))
        ok &= bool(jnp.array_equal(x_out, x))

    assert ok
    print("KERNEL_OK")
</pallas_src>

<mosaic_0001>
module attributes {stable_mosaic.version = 11 : i64} {
  func.func @_gated_attn_kernel(%arg0: i32, %arg1: memref<104x256xf32, #tpu.memory_space<vmem>>, %arg2: memref<256x256xf32, #tpu.memory_space<vmem>>, %arg3: memref<1x256xf32, #tpu.memory_space<vmem>>, %arg4: memref<1x128xf32, #tpu.memory_space<vmem>>, %arg5: memref<1x1xf32, #tpu.memory_space<vmem>>, %arg6: memref<1x1x104xf32, #tpu.memory_space<vmem>>) attributes {dimension_semantics = [#tpu.dimension_semantics<parallel>], iteration_bounds = array<i64: 2>, scalar_prefetch = 0 : i64, scratch_operands = 0 : i64, tpu.core_type = #tpu.core_type<tc>, window_params = [{transform_indices = @transform_0, window_bounds = array<i64: 104, 256>}, {pipeline_mode = #tpu.pipeline_mode<synchronous>, transform_indices = @transform_1, window_bounds = array<i64: 256, 256>}, {pipeline_mode = #tpu.pipeline_mode<synchronous>, transform_indices = @transform_2, window_bounds = array<i64: 1, 256>}, {pipeline_mode = #tpu.pipeline_mode<synchronous>, transform_indices = @transform_3, window_bounds = array<i64: 1, 128>}, {pipeline_mode = #tpu.pipeline_mode<synchronous>, transform_indices = @transform_4, window_bounds = array<i64: 1, 1>}, {transform_indices = @transform_5, window_bounds = array<i64: 1, 1, 104>}]} {
    %c0 = arith.constant 0 : index
    %c0_0 = arith.constant 0 : index
    %0 = vector.load %arg1[%c0, %c0_0] : memref<104x256xf32, #tpu.memory_space<vmem>>, vector<104x256xf32>
    %c0_1 = arith.constant 0 : index
    %c0_2 = arith.constant 0 : index
    %1 = vector.load %arg2[%c0_1, %c0_2] : memref<256x256xf32, #tpu.memory_space<vmem>>, vector<256x256xf32>
    %cst = arith.constant dense<0.000000e+00> : vector<104x256xf32>
    %2 = tpu.matmul %0, %1, %cst {dimension_numbers = #tpu.dot_dimension_numbers<[1], [0], [0], [1], [0, 0, 1, 1], [], []>} : vector<104x256xf32>, vector<256x256xf32>, vector<104x256xf32> -> vector<104x256xf32>
    %c0_3 = arith.constant 0 : index
    %c0_4 = arith.constant 0 : index
    %3 = vector.load %arg3[%c0_3, %c0_4] : memref<1x256xf32, #tpu.memory_space<vmem>>, vector<1x256xf32>
    %4 = vector.broadcast %3 : vector<1x256xf32> to vector<104x256xf32>
    %5 = arith.addf %2, %4 : vector<104x256xf32>
    %6 = vector.extract_strided_slice %5 {offsets = [0, 0], sizes = [104, 128], strides = [1, 1]} : vector<104x256xf32> to vector<104x128xf32>
    %7 = math.tanh %6 : vector<104x128xf32>
    %8 = vector.extract_strided_slice %5 {offsets = [0, 128], sizes = [104, 128], strides = [1, 1]} : vector<104x256xf32> to vector<104x128xf32>
    %cst_5 = arith.constant 5.000000e-01 : f32
    %9 = vector.broadcast %cst_5 : f32 to vector<104x128xf32>
    %10 = arith.mulf %9, %8 : vector<104x128xf32>
    %11 = math.tanh %10 : vector<104x128xf32>
    %cst_6 = arith.constant 1.000000e+00 : f32
    %12 = vector.broadcast %cst_6 : f32 to vector<104x128xf32>
    %13 = arith.addf %11, %12 : vector<104x128xf32>
    %cst_7 = arith.constant 5.000000e-01 : f32
    %14 = vector.broadcast %cst_7 : f32 to vector<104x128xf32>
    %15 = arith.mulf %14, %13 : vector<104x128xf32>
    %16 = arith.mulf %7, %15 : vector<104x128xf32>
    %c0_8 = arith.constant 0 : index
    %c0_9 = arith.constant 0 : index
    %17 = vector.load %arg4[%c0_8, %c0_9] : memref<1x128xf32, #tpu.memory_space<vmem>>, vector<1x128xf32>
    %18 = tpu.transpose %16, [1, 0] : vector<104x128xf32> -> vector<128x104xf32>
    %cst_10 = arith.constant dense<0.000000e+00> : vector<1x104xf32>
    %19 = tpu.matmul %17, %18, %cst_10 {dimension_numbers = #tpu.dot_dimension_numbers<[1], [0], [0], [1], [0, 0, 1, 1], [], []>} : vector<1x128xf32>, vector<128x104xf32>, vector<1x104xf32> -> vector<1x104xf32>
    %c0_11 = arith.constant 0 : index
    %c0_12 = arith.constant 0 : index
    %20 = vector.load %arg5[%c0_11, %c0_12] : memref<1x1xf32, #tpu.memory_space<vmem>>, vector<1x1xf32>
    %21 = vector.broadcast %20 : vector<1x1xf32> to vector<1x104xf32>
    %22 = arith.addf %19, %21 : vector<1x104xf32>
    %23 = vector.shape_cast %22 : vector<1x104xf32> to vector<1x1x104xf32>
    %c0_13 = arith.constant 0 : index
    %c0_14 = arith.constant 0 : index
    %c0_15 = arith.constant 0 : index
    %24 = vector.load %arg6[%c0_13, %c0_14, %c0_15] : memref<1x1x104xf32, #tpu.memory_space<vmem>>, vector<1x1x104xf32>
    tpu.vector_store %arg6[%c0_13, %c0_14, %c0_15], %23 {strides = array<i32>} : memref<1x1x104xf32, #tpu.memory_space<vmem>>, vector<1x1x104xf32>,
    return
  }
  func.func @transform_0(%arg0: i32) -> (i32, i32) {
    %c0_i32 = arith.constant 0 : i32
    %c0_i32_0 = arith.constant 0 : i32
    return %arg0, %c0_i32 : i32, i32
  }
  func.func @transform_1(%arg0: i32) -> (i32, i32) {
    %c0_i32 = arith.constant 0 : i32
    %c0_i32_0 = arith.constant 0 : i32
    %c0_i32_1 = arith.constant 0 : i32
    return %c0_i32, %c0_i32_0 : i32, i32
  }
  func.func @transform_2(%arg0: i32) -> (i32, i32) {
    %c0_i32 = arith.constant 0 : i32
    %c0_i32_0 = arith.constant 0 : i32
    %c0_i32_1 = arith.constant 0 : i32
    return %c0_i32, %c0_i32_0 : i32, i32
  }
  func.func @transform_3(%arg0: i32) -> (i32, i32) {
    %c0_i32 = arith.constant 0 : i32
    %c0_i32_0 = arith.constant 0 : i32
    %c0_i32_1 = arith.constant 0 : i32
    return %c0_i32, %c0_i32_0 : i32, i32
  }
  func.func @transform_4(%arg0: i32) -> (i32, i32) {
    %c0_i32 = arith.constant 0 : i32
    %c0_i32_0 = arith.constant 0 : i32
    %c0_i32_1 = arith.constant 0 : i32
    return %c0_i32, %c0_i32_0 : i32, i32
  }
  func.func @transform_5(%arg0: i32) -> (i32, i32, i32) {
    %c0_i32 = arith.constant 0 : i32
    %c0_i32_0 = arith.constant 0 : i32
    %c0_i32_1 = arith.constant 0 : i32
    return %arg0, %c0_i32, %c0_i32_0 : i32, i32, i32
  }
}

</mosaic_0001>

<bundles_post_ra>
// kernel: attn_net_gated_forward.1
= control target key start
LH: loop header
LB: loop body
LE: loop exit
PB: predicated region body
PF: predicated region fallthrough
CT: control target
= control target key end

     0   :  { %s951_s20 = smov 0   ;;  %s1245_s0 = inlined_call_operand.vmem [shape: f32[200,256], index: 0, kind: input, shape index: {}]   ;;  %s1246_s1 = inlined_call_operand.vmem [shape: f32[256,256], index: 1, kind: input, shape index: {}]   ;;  %s1247_s2 = inlined_call_operand.vmem [shape: f32[1,256], index: 2, kind: input, shape index: {}]   ;;  %s1248_s3 = inlined_call_operand.vmem [shape: f32[1,128], index: 3, kind: input, shape index: {}]   ;;  %s1249_s4 = inlined_call_operand.<no memory space> [shape: f32[1,1], index: 4, kind: input, shape index: {}]   ;;  %s1250_s5 = inlined_call_operand.vmem [shape: f32[2,1,104], index: 5, kind: output, shape index: {}]  }
   0x1   :  { %v10_v0 = vstv %s1249_s4 }
   0x2   :  { %11 = vst [vmem:[#allocation2] sm:$0x1] %v10_v0 }
   0x3 LB: > { %s957_s21 = sadd.s32 4294967295, %s912_s20   ;;  %p710_p0 = scmp.ge.s32.totalorder %s912_s20, 1  ;;  %s912_s20 = sphi %s951_s20, %s17_s20  }
   0x4   : > { %p201_p1 = scmp.lt.s32.totalorder %s912_s20, 3 }
   0x6   : > { %p202_p2 = pnand %p710_p0, %p201_p1 }
   0x7   : > { %v280_v1 = vld [vmem:[%s1246_s1 + $0x8] sm:$0xff] (!%p202_p2)  ;;  %v282_v2 = vld [vmem:[%s1246_s1 + $0x18] sm:$0xff] (!%p202_p2)  ;;  %v279_v3 = vld [vmem:[%s1246_s1] sm:$0xff] (!%p202_p2)  ;;  %s233_s16 = smul.u32 (!%p202_p2), 13, %s957_s21  ;;  %vm915_vm0 = vmmov (!%p202_p2), 0   ;;  %p250_p4 = scmp.lt.s32.totalorder (!%p202_p2), %s957_s21, 1 }
   0x8   : > { %205 = sbr.rel (%p202_p2) target bundleno = 580 (0x244), region = 40  ;;  %v759_v4 = vpack.c.bf16 (!%p202_p2), %v282_v2, %v280_v1  ;;  %v281_v5 = vld [vmem:[%s1246_s1 + $0x10] sm:$0xff] (!%p202_p2)  ;;  %v284_v6 = vld [vmem:[%s1246_s1 + $0x28] sm:$0xff] (!%p202_p2)  ;;  %v286_v7 = vld [vmem:[%s1246_s1 + $0x38] sm:$0xff] (!%p202_p2)  ;;  %vm657_vm1 = vcmask (!%p202_p2), 843776  }
   0x9   : > { %v761_v8 = vpack.c.bf16 (!%p202_p2), %v281_v5, %v279_v3  ;;  %v763_v9 = vpack.c.bf16 (!%p202_p2), %v286_v7, %v284_v6  ;;  %v283_v10 = vld [vmem:[%s1246_s1 + $0x20] sm:$0xff] (!%p202_p2)  ;;  %v285_v11 = vld [vmem:[%s1246_s1 + $0x30] sm:$0xff] (!%p202_p2)  ;;  %v288_v12 = vld [vmem:[%s1246_s1 + $0x48] sm:$0xff] (!%p202_p2)  ;;  %p239_p3 = scmp.lt.s32.totalorder (!%p202_p2), %s233_s16, 24 }
   0xa   : > { %760 = vmatprep.subr.bf16.mxu0 (!%p202_p2), %v759_v4  ;;  %v290_v13 = vld [vmem:[%s1246_s1 + $0x58] sm:$0xff] (!%p202_p2)  ;;  %v765_v14 = vpack.c.bf16 (!%p202_p2), %v285_v11, %v283_v10  ;;  %v287_v16 = vld [vmem:[%s1246_s1 + $0x40] sm:$0xff] (!%p202_p2)  ;;  %v289_v17 = vld [vmem:[%s1246_s1 + $0x50] sm:$0xff] (!%p202_p2) }
   0xb   : > { %762 = vmatpush1.bf16.msra.mxu0 (!%p202_p2), %v761_v8  ;;  %v767_v15 = vpack.c.bf16 (!%p202_p2), %v290_v13, %v288_v12  ;;  %v292_v18 = vld [vmem:[%s1246_s1 + $0x68] sm:$0xff] (!%p202_p2)  ;;  %v294_v19 = vld [vmem:[%s1246_s1 + $0x78] sm:$0xff] (!%p202_p2)  ;;  %v769_v20 = vpack.c.bf16 (!%p202_p2), %v289_v17, %v287_v16  ;;  %v291_v22 = vld [vmem:[%s1246_s1 + $0x60] sm:$0xff] (!%p202_p2) }
   0xc   : > { %764 = vmatprep.subr.bf16.mxu0 (!%p202_p2), %v763_v9  ;;  %v771_v21 = vpack.c.bf16 (!%p202_p2), %v294_v19, %v292_v18  ;;  %v293_v23 = vld [vmem:[%s1246_s1 + $0x70] sm:$0xff] (!%p202_p2)  ;;  %v296_v24 = vld [vmem:[%s1246_s1 + $0x88] sm:$0xff] (!%p202_p2)  ;;  %v298_v25 = vld [vmem:[%s1246_s1 + $0x98] sm:$0xff] (!%p202_p2) }
   0xd   : > { %v773_v26 = vpack.c.bf16 (!%p202_p2), %v293_v23, %v291_v22  ;;  %v775_v27 = vpack.c.bf16 (!%p202_p2), %v298_v25, %v296_v24  ;;  %v295_v28 = vld [vmem:[%s1246_s1 + $0x80] sm:$0xff] (!%p202_p2)  ;;  %v297_v29 = vld [vmem:[%s1246_s1 + $0x90] sm:$0xff] (!%p202_p2)  ;;  %v300_v30 = vld [vmem:[%s1246_s1 + $0xa8] sm:$0xff] (!%p202_p2) }
   0xe   : > { %v302_v31 = vld [vmem:[%s1246_s1 + $0xb8] sm:$0xff] (!%p202_p2)  ;;  %v777_v32 = vpack.c.bf16 (!%p202_p2), %v297_v29, %v295_v28  ;;  %v299_v34 = vld [vmem:[%s1246_s1 + $0xa0] sm:$0xff] (!%p202_p2)  ;;  %v301_v35 = vld [vmem:[%s1246_s1 + $0xb0] sm:$0xff] (!%p202_p2) }
   0xf   : > { %766 = vmatpush1.bf16.msra.mxu0 %v765_v14  ;;  %s1252_s16 = smov (!%p239_p3, %s233_s16), 24  ;;  %v779_v33 = vpack.c.bf16 %v302_v31, %v300_v30  ;;  %v304_v36 = vld [vmem:[%s1246_s1 + $0xc8] sm:$0xff]  ;;  %v306_v37 = vld [vmem:[%s1246_s1 + $0xd8] sm:$0xff]  ;;  %v781_v38 = vpack.c.bf16 %v301_v35, %v299_v34  ;;  %v303_v40 = vld [vmem:[%s1246_s1 + $0xc0] sm:$0xff]  ;;  %s1254_s21 = smov (!%p250_p4, %s957_s21), 1 }
  0x10   : > { %768 = vmatprep.subr.bf16.mxu0 %v767_v15  ;;  %s715_s18 = sshll.u32 %s1252_s16, 4  ;;  %v783_v39 = vpack.c.bf16 %v306_v37, %v304_v36  ;;  %v305_v41 = vld [vmem:[%s1246_s1 + $0xd0] sm:$0xff]  ;;  %v308_v43 = vld [vmem:[%s1246_s1 + $0xe8] sm:$0xff]  ;;  %v310_v44 = vld [vmem:[%s1246_s1 + $0xf8] sm:$0xff] }
  0x11   : > { %s1043_s29 = scalar_lea.vmem %s1245_s0, %s715_s18  ;;  %v785_v45 = vpack.c.bf16 %v305_v41, %v303_v40  ;;  %v787_v46 = vpack.c.bf16 %v310_v44, %v308_v43  ;;  %v307_v47 = vld [vmem:[%s1246_s1 + $0xe0] sm:$0xff]  ;;  %v309_v48 = vld [vmem:[%s1246_s1 + $0xf0] sm:$0xff]  ;;  %v312_v49 = vld [vmem:[%s1246_s1 + $0x108] sm:$0xff]  ;;  %s252_s18 = scalar_lea.vmem %s1250_s5, %s1254_s21 }
  0x12   : > { %v254_v42 = vld [vmem:[%s1043_s29 + $0x8] sm:$0xff]  ;;  %v314_v50 = vld [vmem:[%s1246_s1 + $0x118] sm:$0xff]  ;;  %v789_v51 = vpack.c.bf16 %v309_v48, %v307_v47  ;;  %v311_v53 = vld [vmem:[%s1246_s1 + $0x100] sm:$0xff] }
  0x13   : > { %770 = vmatpush1.bf16.msra.mxu0 %v769_v20  ;;  %419 = vmatprep.mubr.f32.mxu0 %v254_v42  ;;  %v791_v52 = vpack.c.bf16 %v314_v50, %v312_v49  ;;  %v313_v54 = vld [vmem:[%s1246_s1 + $0x110] sm:$0xff]  ;;  %v316_v55 = vld [vmem:[%s1246_s1 + $0x128] sm:$0xff]  ;;  %v318_v56 = vld [vmem:[%s1246_s1 + $0x138] sm:$0xff] }
  0x14   : > { %772 = vmatprep.subr.bf16.mxu0 %v771_v21  ;;  %v793_v57 = vpack.c.bf16 %v313_v54, %v311_v53  ;;  %v795_v58 = vpack.c.bf16 %v318_v56, %v316_v55  ;;  %v315_v59 = vld [vmem:[%s1246_s1 + $0x120] sm:$0xff]  ;;  %v317_v60 = vld [vmem:[%s1246_s1 + $0x130] sm:$0xff]  ;;  %v320_v61 = vld [vmem:[%s1246_s1 + $0x148] sm:$0xff] }
  0x15   : > { %v322_v62 = vld [vmem:[%s1246_s1 + $0x158] sm:$0xff]  ;;  %v797_v63 = vpack.c.bf16 %v317_v60, %v315_v59  ;;  %v319_v1 = vld [vmem:[%s1246_s1 + $0x140] sm:$0xff]  ;;  %v321_v2 = vld [vmem:[%s1246_s1 + $0x150] sm:$0xff]  ;;  %v914_v59 = vmov 0.0|0.0   ;;  %v916_v60 = vmov 0.0  }
  0x16   : > { %v799_v0 = vpack.c.bf16 %v322_v62, %v320_v61  ;;  %v324_v3 = vld [vmem:[%s1246_s1 + $0x168] sm:$0xff]  ;;  %v326_v4 = vld [vmem:[%s1246_s1 + $0x178] sm:$0xff]  ;;  %v801_v5 = vpack.c.bf16 %v321_v2, %v319_v1  ;;  %v323_v7 = vld [vmem:[%s1246_s1 + $0x160] sm:$0xff]  ;;  %823 = vmatprep.subr.bf16.mxu1 %v914_v59  ;;  %756 = vmatprep.mubr.msk.f32.mxu1 %vm915_vm0, %v916_v60  ;;  %v917_v62 = vmov 0  }
  0x17   : > { %774 = vmatpush1.bf16.msra.mxu0 %v773_v26  ;;  %v803_v6 = vpack.c.bf16 %v326_v4, %v324_v3  ;;  %v325_v8 = vld [vmem:[%s1246_s1 + $0x170] sm:$0xff]  ;;  %v328_v9 = vld [vmem:[%s1246_s1 + $0x188] sm:$0xff]  ;;  %v330_v10 = vld [vmem:[%s1246_s1 + $0x198] sm:$0xff]  ;;  %853 = vset.pattern.permute.xlu0 %v917_v62 }
  0x18   : > { %776 = vmatprep.subr.bf16.mxu0 %v775_v27  ;;  %v805_v11 = vpack.c.bf16 %v325_v8, %v323_v7  ;;  %v807_v12 = vpack.c.bf16 %v330_v10, %v328_v9  ;;  %v327_v13 = vld [vmem:[%s1246_s1 + $0x180] sm:$0xff]  ;;  %v329_v14 = vld [vmem:[%s1246_s1 + $0x190] sm:$0xff]  ;;  %v332_v15 = vld [vmem:[%s1246_s1 + $0x1a8] sm:$0xff] }
  0x19   : > { %v334_v16 = vld [vmem:[%s1246_s1 + $0x1b8] sm:$0xff]  ;;  %v809_v17 = vpack.c.bf16 %v329_v14, %v327_v13  ;;  %v331_v19 = vld [vmem:[%s1246_s1 + $0x1a0] sm:$0xff]  ;;  %v333_v20 = vld [vmem:[%s1246_s1 + $0x1b0] sm:$0xff] }
  0x1a   : > { %v811_v18 = vpack.c.bf16 %v334_v16, %v332_v15  ;;  %v336_v21 = vld [vmem:[%s1246_s1 + $0x1c8] sm:$0xff]  ;;  %v338_v22 = vld [vmem:[%s1246_s1 + $0x1d8] sm:$0xff]  ;;  %v813_v23 = vpack.c.bf16 %v333_v20, %v331_v19  ;;  %v335_v25 = vld [vmem:[%s1246_s1 + $0x1c0] sm:$0xff] }
  0x1b   : > { %778 = vmatpush1.bf16.msra.mxu0 %v777_v32  ;;  %v815_v24 = vpack.c.bf16 %v338_v22, %v336_v21  ;;  %v337_v26 = vld [vmem:[%s1246_s1 + $0x1d0] sm:$0xff]  ;;  %v340_v27 = vld [vmem:[%s1246_s1 + $0x1e8] sm:$0xff]  ;;  %v342_v28 = vld [vmem:[%s1246_s1 + $0x1f8] sm:$0xff] }
  0x1c   : > { %780 = vmatprep.subr.bf16.mxu0 %v779_v33  ;;  %v817_v29 = vpack.c.bf16 %v337_v26, %v335_v25  ;;  %v819_v30 = vpack.c.bf16 %v342_v28, %v340_v27  ;;  %v339_v31 = vld [vmem:[%s1246_s1 + $0x1e0] sm:$0xff]  ;;  %v341_v32 = vld [vmem:[%s1246_s1 + $0x1f0] sm:$0xff]  ;;  %v256_v35 = vld [vmem:[%s1043_s29 + $0x18] sm:$0xff] }
  0x1d   : > { %v821_v33 = vpack.c.bf16 %v341_v32, %v339_v31  ;;  %v253_v34 = vld [vmem:[%s1043_s29] sm:$0xff]  ;;  %v255_v36 = vld [vmem:[%s1043_s29 + $0x10] sm:$0xff]  ;;  %v258_v37 = vld [vmem:[%s1043_s29 + $0x28] sm:$0xff] }
  0x1e   : > { %v259_v40 = vld [vmem:[%s1043_s29 + $0x30] sm:$0xff]  ;;  %v262_v41 = vld [vmem:[%s1043_s29 + $0x48] sm:$0xff]  ;;  %v261_v42 = vld [vmem:[%s1043_s29 + $0x40] sm:$0xff] }
  0x1f   : > { %782 = vmatpush1.bf16.msra.mxu0 %v781_v38  ;;  %v257_v38 = vld [vmem:[%s1043_s29 + $0x20] sm:$0xff]  ;;  %v264_v43 = vld [vmem:[%s1043_s29 + $0x58] sm:$0xff]  ;;  %v263_v44 = vld [vmem:[%s1043_s29 + $0x50] sm:$0xff] }
  0x20   : > { %784 = vmatprep.subr.bf16.mxu0 %v783_v39  ;;  %v260_v39 = vld [vmem:[%s1043_s29 + $0x38] sm:$0xff]  ;;  %v267_v48 = vld [vmem:[%s1043_s29 + $0x70] sm:$0xff]  ;;  %v270_v49 = vld [vmem:[%s1043_s29 + $0x88] sm:$0xff] }
  0x21   : > { %v268_v47 = vld [vmem:[%s1043_s29 + $0x78] sm:$0xff]  ;;  %v269_v50 = vld [vmem:[%s1043_s29 + $0x80] sm:$0xff]  ;;  %v274_v53 = vld [vmem:[%s1043_s29 + $0xa8] sm:$0xff] }
  0x22   : > { %v273_v54 = vld [vmem:[%s1043_s29 + $0xa0] sm:$0xff]  ;;  %v276_v55 = vld [vmem:[%s1043_s29 + $0xb8] sm:$0xff]  ;;  %v275_v56 = vld [vmem:[%s1043_s29 + $0xb0] sm:$0xff] }
  0x23   : > { %786 = vmatpush1.bf16.msra.mxu0 %v785_v45  ;;  %v266_v45 = vld [vmem:[%s1043_s29 + $0x68] sm:$0xff]  ;;  %v577_v61 = vld [vmem:[#allocation2] sm:$0x1] }
  0x24   : > { %788 = vmatprep.subr.bf16.mxu0 %v787_v46  ;;  %v265_v46 = vld [vmem:[%s1043_s29 + $0x60] sm:$0xff]  ;;  %580 = vperm.xlu0 %853, %v577_v61  }
  0x25   : > { %v343_v2 = vld [vmem:[%s1247_s2] sm:$0x3] }
  0x27   : > { %790 = vmatpush1.bf16.msra.mxu0 %v789_v51  ;;  %v272_v51 = vld [vmem:[%s1043_s29 + $0x98] sm:$0xff] }
  0x28   : > { %792 = vmatprep.subr.bf16.mxu0 %v791_v52  ;;  %v271_v52 = vld [vmem:[%s1043_s29 + $0x90] sm:$0xff] }
  0x2b   : > { %794 = vmatpush1.bf16.msra.mxu0 %v793_v57  ;;  %v278_v57 = vld [vmem:[%s1043_s29 + $0xc8] sm:$0xff] }
  0x2c   : > { %796 = vmatprep.subr.bf16.mxu0 %v795_v58  ;;  %v277_v58 = vld [vmem:[%s1043_s29 + $0xc0] sm:$0xff] }
  0x2f   : > { %798 = vmatpush1.bf16.msra.mxu0 %v797_v63  ;;  %v345_v63 = vlaneseq }
  0x30   : > { %800 = vmatprep.subr.bf16.mxu0 %v799_v0 }
  0x31   : > { %v1187_v0 = vshrl.u32 %v345_v63, 7 }
  0x33   : > { %802 = vmatpush1.bf16.msra.mxu0 %v801_v5  ;;  %v351_v1 = vsub.s32 1, %v1187_v0  ;;  %v347_v3 = vsub.s32 0, %v1187_v0 }
  0x34   : > { %804 = vmatprep.subr.bf16.mxu0 %v803_v6 }
  0x35   : > { %v1194_v4 = vrot.slane %v343_v2, %v351_v1  ;;  %v1198_v6 = vrot.slane %v343_v2, %v347_v3 }
  0x37   : > { %806 = vmatpush1.bf16.msra.mxu0 %v805_v11 }
  0x38   : > { %808 = vmatprep.subr.bf16.mxu0 %v807_v12 }
  0x3b   : > { %810 = vmatpush1.bf16.msra.mxu0 %v809_v17 }
  0x3c   : > { %812 = vmatprep.subr.bf16.mxu0 %v811_v18 }
  0x3f   : > { %814 = vmatpush1.bf16.msra.mxu0 %v813_v23 }
  0x40   : > { %816 = vmatprep.subr.bf16.mxu0 %v815_v24 }
  0x43   : > { %818 = vmatpush1.bf16.msra.mxu0 %v817_v29 }
  0x44   : > { %820 = vmatprep.subr.bf16.mxu0 %v819_v30 }
  0x47   : > { %822 = vmatpush1.bf16.msra.mxu0 %v821_v33 }
  0x4a   : > { %420 = vmatmul.mubr.f32.vlgmr.msra.gmra.mrb[0].mxu0 %v253_v34 }
  0x4b   : > { %425 = vmatprep.mubr.f32.mxu0 %v256_v35 }
  0x4e   : > { %426 = vmatmul.mubr.f32.gmra.mrb[2].mxu0 %v255_v36 }
  0x4f   : > { %431 = vmatprep.mubr.f32.mxu0 %v258_v37 }
  0x52   : > { %432 = vmatmul.mubr.f32.gmra.mrb[4].mxu0 %v257_v38 }
  0x53   : > { %437 = vmatprep.mubr.f32.mxu0 %v260_v39 }
  0x56   : > { %438 = vmatmul.mubr.f32.gmra.mrb[6].mxu0 %v259_v40 }
  0x57   : > { %443 = vmatprep.mubr.f32.mxu0 %v262_v41 }
  0x5a   : > { %444 = vmatmul.mubr.f32.gmra.mrb[8].mxu0 %v261_v42 }
  0x5b   : > { %449 = vmatprep.mubr.f32.mxu0 %v264_v43 }
  0x5e   : > { %450 = vmatmul.mubr.f32.gmra.mrb[10].mxu0 %v263_v44 }
  0x5f   : > { %455 = vmatprep.mubr.f32.mxu0 %v266_v45 }
  0x62   : > { %456 = vmatmul.mubr.f32.gmra.mrb[12].mxu0 %v265_v46 }
  0x63   : > { %461 = vmatprep.mubr.f32.mxu0 %v268_v47 }
  0x66   : > { %462 = vmatmul.mubr.f32.gmra.mrb[14].mxu0 %v267_v48 }
  0x67   : > { %467 = vmatprep.mubr.f32.mxu0 %v270_v49 }
  0x6a   : > { %468 = vmatmul.mubr.f32.gmra.mrb[16].mxu0 %v269_v50 }
  0x6b   : > { %473 = vmatprep.mubr.f32.mxu0 %v272_v51 }
  0x6e   : > { %474 = vmatmul.mubr.f32.gmra.mrb[18].mxu0 %v271_v52 }
  0x6f   : > { %479 = vmatprep.mubr.f32.mxu0 %v274_v53 }
  0x72   : > { %480 = vmatmul.mubr.f32.gmra.mrb[20].mxu0 %v273_v54 }
  0x73   : > { %485 = vmatprep.mubr.f32.mxu0 %v276_v55 }
  0x76   : > { %486 = vmatmul.mubr.f32.gmra.mrb[22].mxu0 %v275_v56 }
  0x77   : > { %491 = vmatprep.mubr.f32.mxu0 %v278_v57 }
  0x7a   : > { %492 = vmatmul.mubr.f32.gmra.mrb[24].mxu0 %v277_v58 }
 0x11d   : > { %v421_v5 = vpop.f32.mrb[0].mxu0 }
 0x11e   : > { %v423_v7 = vpop.f32.mrb[1].mxu0  ;;  %v422_v11 = vadd.f32 %v421_v5, %v1198_v6 }
 0x11f   : > { %v424_v8 = vadd.f32 %v423_v7, %v1194_v4 }
 0x121   : > { %v511_v9 = vmul.f32 0.5, %v424_v8  ;;  %v427_v10 = vpop.f32.mrb[2].mxu0 }
 0x122   : > { %v429_v12 = vpop.f32.mrb[3].mxu0  ;;  %v428_v16 = vadd.f32 %v427_v10, %v1198_v6 }
 0x123   : > { %854 = vtanh.f32 %v511_v9  ;;  %v430_v13 = vadd.f32 %v429_v12, %v1194_v4 }
 0x124   : > { %856 = vtanh.f32 %v422_v11 }
 0x125   : > { %v512_v14 = vmul.f32 0.5, %v430_v13  ;;  %v433_v15 = vpop.f32.mrb[4].mxu0 }
 0x126   : > { %v435_v17 = vpop.f32.mrb[5].mxu0  ;;  %v434_v21 = vadd.f32 %v433_v15, %v1198_v6 }
 0x127   : > { %858 = vtanh.f32 %v512_v14  ;;  %v436_v18 = vadd.f32 %v435_v17, %v1194_v4 }
 0x128   : > { %860 = vtanh.f32 %v428_v16 }
 0x129   : > { %v513_v19 = vmul.f32 0.5, %v436_v18  ;;  %v439_v20 = vpop.f32.mrb[6].mxu0 }
 0x12a   : > { %v441_v22 = vpop.f32.mrb[7].mxu0  ;;  %v440_v28 = vadd.f32 %v439_v20, %v1198_v6 }
 0x12b   : > { %862 = vtanh.f32 %v513_v19  ;;  %v442_v23 = vadd.f32 %v441_v22, %v1194_v4 }
 0x12c   : > { %864 = vtanh.f32 %v434_v21 }
 0x12d   : > { %v855_v24 = vpop.eup %854  ;;  %v514_v25 = vmul.f32 0.5, %v442_v23  ;;  %v445_v26 = vpop.f32.mrb[8].mxu0 }
 0x12e   : > { %v537_v27 = vadd.f32 1.0, %v855_v24  ;;  %v447_v29 = vpop.f32.mrb[9].mxu0  ;;  %v857_v31 = vpop.eup %856  ;;  %v446_v37 = vadd.f32 %v445_v26, %v1198_v6 }
 0x12f   : > { %866 = vtanh.f32 %v514_v25  ;;  %v448_v30 = vadd.f32 %v447_v29, %v1194_v4 }
 0x130   : > { %v550_v32 = vmul.f32 0.5, %v537_v27  ;;  %868 = vtanh.f32 %v440_v28 }
 0x131   : > { %v859_v33 = vpop.eup %858  ;;  %v515_v34 = vmul.f32 0.5, %v448_v30  ;;  %v451_v35 = vpop.f32.mrb[10].mxu0 }
 0x132   : > { %v538_v36 = vadd.f32 1.0, %v859_v33  ;;  %v453_v38 = vpop.f32.mrb[11].mxu0  ;;  %v563_v39 = vmul.f32 %v857_v31, %v550_v32  ;;  %v861_v41 = vpop.eup %860  ;;  %v452_v47 = vadd.f32 %v451_v35, %v1198_v6 }
 0x133   : > { %870 = vtanh.f32 %v515_v34  ;;  %v454_v40 = vadd.f32 %v453_v38, %v1194_v4 }
 0x134   : > { %v551_v42 = vmul.f32 0.5, %v538_v36  ;;  %872 = vtanh.f32 %v446_v37 }
 0x135   : > { %v863_v43 = vpop.eup %862  ;;  %v516_v44 = vmul.f32 0.5, %v454_v40  ;;  %v457_v45 = vpop.f32.mrb[12].mxu0 }
 0x136   : > { %v539_v46 = vadd.f32 1.0, %v863_v43  ;;  %v459_v48 = vpop.f32.mrb[13].mxu0  ;;  %v564_v49 = vmul.f32 %v861_v41, %v551_v42  ;;  %v865_v51 = vpop.eup %864  ;;  %v458_v58 = vadd.f32 %v457_v45, %v1198_v6 }
 0x137   : > { %874 = vtanh.f32 %v516_v44  ;;  %v460_v50 = vadd.f32 %v459_v48, %v1194_v4 }
 0x138   : > { %v552_v52 = vmul.f32 0.5, %v539_v46  ;;  %v824_v53 = vpack.c.bf16 %v564_v49, %v563_v39  ;;  %876 = vtanh.f32 %v452_v47 }
 0x139   : > { %v867_v54 = vpop.eup %866  ;;  %v517_v55 = vmul.f32 0.5, %v460_v50  ;;  %v463_v56 = vpop.f32.mrb[14].mxu0 }
 0x13a   : > { %v540_v57 = vadd.f32 1.0, %v867_v54  ;;  %v465_v61 = vpop.f32.mrb[15].mxu0  ;;  %825 = vmatpush3.bf16.xpose.msra.mxu1 %v824_v53  ;;  %v565_v62 = vmul.f32 %v865_v51, %v552_v52  ;;  %v869_v1 = vpop.eup %868  ;;  %v464_v10 = vadd.f32 %v463_v56, %v1198_v6 }
 0x13b   : > { %878 = vtanh.f32 %v517_v55  ;;  %v466_v63 = vadd.f32 %v465_v61, %v1194_v4  ;;  %826 = vmatprep.subr.bf16.mxu1 %v914_v59 }
 0x13c   : > { %v553_v2 = vmul.f32 0.5, %v540_v57  ;;  %880 = vtanh.f32 %v458_v58 }
 0x13d   : > { %v871_v5 = vpop.eup %870  ;;  %v518_v7 = vmul.f32 0.5, %v466_v63  ;;  %v469_v8 = vpop.f32.mrb[16].mxu0 }
 0x13e   : > { %v541_v9 = vadd.f32 1.0, %v871_v5  ;;  %v471_v11 = vpop.f32.mrb[17].mxu0  ;;  %v566_v12 = vmul.f32 %v869_v1, %v553_v2  ;;  %v873_v14 = vpop.eup %872  ;;  %v470_v21 = vadd.f32 %v469_v8, %v1198_v6 }
 0x13f   : > { %882 = vtanh.f32 %v518_v7  ;;  %v472_v13 = vadd.f32 %v471_v11, %v1194_v4 }
 0x140   : > { %v554_v15 = vmul.f32 0.5, %v541_v9  ;;  %v827_v16 = vpack.c.bf16 %v566_v12, %v565_v62  ;;  %884 = vtanh.f32 %v464_v10 }
 0x141   : > { %v875_v17 = vpop.eup %874  ;;  %v519_v18 = vmul.f32 0.5, %v472_v13  ;;  %v475_v19 = vpop.f32.mrb[18].mxu0 }
 0x142   : > { %v542_v20 = vadd.f32 1.0, %v875_v17  ;;  %v477_v22 = vpop.f32.mrb[19].mxu0  ;;  %828 = vmatpush3.bf16.xpose.msra.mxu1 %v827_v16  ;;  %v567_v23 = vmul.f32 %v873_v14, %v554_v15  ;;  %v877_v25 = vpop.eup %876  ;;  %v476_v31 = vadd.f32 %v475_v19, %v1198_v6 }
 0x143   : > { %886 = vtanh.f32 %v519_v18  ;;  %v478_v24 = vadd.f32 %v477_v22, %v1194_v4  ;;  %829 = vmatprep.subr.bf16.mxu1 %v914_v59 }
 0x144   : > { %v555_v26 = vmul.f32 0.5, %v542_v20  ;;  %888 = vtanh.f32 %v470_v21 }
 0x145   : > { %v879_v27 = vpop.eup %878  ;;  %v520_v28 = vmul.f32 0.5, %v478_v24  ;;  %v481_v29 = vpop.f32.mrb[20].mxu0  ;;  %v576_v24 = vld [vmem:[%s1248_s3] sm:$0x1] }
 0x146   : > { %v543_v30 = vadd.f32 1.0, %v879_v27  ;;  %v483_v32 = vpop.f32.mrb[21].mxu0  ;;  %v568_v33 = vmul.f32 %v877_v25, %v555_v26  ;;  %v881_v35 = vpop.eup %880  ;;  %v482_v42 = vadd.f32 %v481_v29, %v1198_v6 }
 0x147   : > { %890 = vtanh.f32 %v520_v28  ;;  %v484_v34 = vadd.f32 %v483_v32, %v1194_v4 }
 0x148   : > { %v556_v36 = vmul.f32 0.5, %v543_v30  ;;  %v830_v37 = vpack.c.bf16 %v568_v33, %v567_v23  ;;  %892 = vtanh.f32 %v476_v31 }
 0x149   : > { %v883_v38 = vpop.eup %882  ;;  %v521_v39 = vmul.f32 0.5, %v484_v34  ;;  %v487_v40 = vpop.f32.mrb[22].mxu0 }
 0x14a   : > { %v544_v41 = vadd.f32 1.0, %v883_v38  ;;  %v489_v43 = vpop.f32.mrb[23].mxu0  ;;  %831 = vmatpush3.bf16.xpose.msra.mxu1 %v830_v37  ;;  %v569_v44 = vmul.f32 %v881_v35, %v556_v36  ;;  %v885_v46 = vpop.eup %884  ;;  %v488_v52 = vadd.f32 %v487_v40, %v1198_v6 }
 0x14b   : > { %894 = vtanh.f32 %v521_v39  ;;  %v490_v45 = vadd.f32 %v489_v43, %v1194_v4  ;;  %832 = vmatprep.subr.bf16.mxu1 %v914_v59 }
 0x14c   : > { %v557_v47 = vmul.f32 0.5, %v544_v41  ;;  %896 = vtanh.f32 %v482_v42 }
 0x14d   : > { %v887_v48 = vpop.eup %886  ;;  %v522_v49 = vmul.f32 0.5, %v490_v45  ;;  %v493_v50 = vpop.f32.mrb[24].mxu0 }
 0x14e   : > { %v545_v51 = vadd.f32 1.0, %v887_v48  ;;  %v495_v53 = vpop.f32.mrb[25].mxu0  ;;  %v570_v54 = vmul.f32 %v885_v46, %v557_v47  ;;  %v889_v56 = vpop.eup %888  ;;  %v494_v62 = vadd.f32 %v493_v50, %v1198_v6 }
 0x14f   : > { %898 = vtanh.f32 %v522_v49  ;;  %v496_v55 = vadd.f32 %v495_v53, %v1194_v4 }
 0x150   : > { %v558_v57 = vmul.f32 0.5, %v545_v51  ;;  %v833_v58 = vpack.c.bf16 %v570_v54, %v569_v44  ;;  %900 = vtanh.f32 %v488_v52 }
 0x151   : > { %v891_v61 = vpop.eup %890  ;;  %v523_v63 = vmul.f32 0.5, %v496_v55 }
 0x152   : > { %v546_v1 = vadd.f32 1.0, %v891_v61  ;;  %834 = vmatpush3.bf16.xpose.msra.mxu1 %v833_v58  ;;  %v571_v2 = vmul.f32 %v889_v56, %v558_v57  ;;  %v893_v5 = vpop.eup %892 }
 0x153   : > { %902 = vtanh.f32 %v523_v63  ;;  %835 = vmatprep.subr.bf16.mxu1 %v914_v59 }
 0x154   : > { %v559_v7 = vmul.f32 0.5, %v546_v1  ;;  %904 = vtanh.f32 %v494_v62 }
 0x155   : > { %v895_v8 = vpop.eup %894 }
 0x156   : > { %v547_v9 = vadd.f32 1.0, %v895_v8  ;;  %v572_v4 = vmul.f32 %v893_v5, %v559_v7  ;;  %v897_v10 = vpop.eup %896 }
 0x158   : > { %v560_v11 = vmul.f32 0.5, %v547_v9  ;;  %v836_v12 = vpack.c.bf16 %v572_v4, %v571_v2 }
 0x159   : > { %v899_v13 = vpop.eup %898 }
 0x15a   : > { %v548_v14 = vadd.f32 1.0, %v899_v13  ;;  %837 = vmatpush3.bf16.xpose.msra.mxu1 %v836_v12  ;;  %v573_v6 = vmul.f32 %v897_v10, %v560_v11  ;;  %v901_v15 = vpop.eup %900 }
 0x15b   : > { %838 = vmatprep.subr.bf16.mxu1 %v914_v59  ;;  %v581_v59 = vpop.permute.xlu0 %580 }
 0x15c   : > { %v561_v16 = vmul.f32 0.5, %v548_v14  ;;  %v586_v25 = vrot.slane %v581_v59, %v347_v3 }
 0x15d   : > { %v903_v17 = vpop.eup %902 }
 0x15e   : > { %v549_v18 = vadd.f32 1.0, %v903_v17  ;;  %v574_v19 = vmul.f32 %v901_v15, %v561_v16  ;;  %v905_v20 = vpop.eup %904 }
 0x160   : > { %v562_v21 = vmul.f32 0.5, %v549_v18  ;;  %v839_v22 = vpack.c.bf16 %v574_v19, %v573_v6 }
 0x162   : > { %840 = vmatpush3.bf16.xpose.msra.mxu1 %v839_v22  ;;  %v575_v23 = vmul.f32 %v905_v20, %v562_v21 }
 0x163   : > { %754 = vmatprep.subr.mxu1 %v916_v60 }
 0x16a   : > { %755 = vmatpush3.xpose.msra.mxu1 %v575_v23 }
 0x16d   : > { %757 = vmatmul.mubr.f32.vlgmr.msra.gmra.mrb[0].mxu1 %v576_v24 }
 0x240   : > { %v653_v26 = vpop.f32.mrb[0].mxu1 }
 0x241   : > { %v654_v27 = vadd.f32 %v653_v26, %v586_v25  ;;  %v758_v60 = vpop.f32.mrb[1].mxu1 }
 0x243   : > { %658 = vst.msk [vmem:[%s252_s18] sm:$0x1] %vm657_vm1, %v654_v27 }
 0x244 PF: > { %s17_s20 = sadd.s32 1, %s912_s20  }
 0x245   : > { %p14_p5 = scmp.ge.s32.totalorder %s17_s20, 4  }
 0x247   :  { %16 = sbr.rel (!%p14_p5) target bundleno = 3 (0x3), region = 70 }

</bundles_post_ra>
